<compile_context>
chip_gen: v5e
topology: v5e:2x2
jax: 0.10.0
libtpu: 0.0.40
codegen_flags: <defaults>
</compile_context>

<pallas_src>
import functools

import jax
import jax.numpy as jnp
from jax.experimental import pallas as pl
from jax.experimental.pallas import tpu as pltpu


def _linear_kernel(x_ref, w_ref, b_ref, o_ref):
    """o = x @ W.T + b with f32 accumulation on the MXU.

    x_ref: (tb, F) activation tile.
    w_ref: (C, F) weight in PyTorch nn.Linear layout (lane-dense rows in HBM);
           may be bf16 (pre-cast at init) -- upcast on the VPU if x is wider.
    b_ref: (1, C) bias.
    """
    x = x_ref[...]
    w = w_ref[...]
    if w.dtype != x.dtype:
        # In-kernel upcast (VPU, plenty of slack in this DMA-bound kernel):
        # keeps the W DMA at bf16 size while accumulation stays f32.
        w = w.astype(x.dtype)
    acc = jax.lax.dot_general(
        x, w,
        dimension_numbers=(((1,), (1,)), ((), ())),  # contract F with F (W transposed)
        preferred_element_type=jnp.float32,
    )
    o_ref[...] = (acc + b_ref[...].astype(jnp.float32)).astype(o_ref.dtype)


def _pick_tb(batch):
    """Batch tile: divides B, multiple of 8 (unless == B), <= 512 rows, and for
    B > 128 leaves >= 2 grid steps so the v7x megacore split can engage."""
    if batch <= 128:
        return batch
    for t in range(512, 7, -8):
        if batch % t == 0 and batch // t >= 2:
            return t
    return batch  # no aligned divisor: single tile, grid=(1,)


def _vmem_limit_bytes():
    """Scoped-VMEM limit: above the 32 MiB default, with headroom under the
    chip's physical VMEM (128 MiB on v5e/v6e, 64 MiB on v7x)."""
    try:
        cap = int(pltpu.get_tpu_info().vmem_capacity_bytes)
    except Exception:  # interpret mode / older jax: conservative fallback
        cap = 64 * 1024 * 1024
    return int(max(32 * 1024 * 1024, min(3 * cap // 4, 96 * 1024 * 1024)))


@functools.partial(jax.jit, static_argnames=("tb",))
def base_classifier_forward(x, w, b, *, tb=None):
    """y = x @ w.T + b  (the nn.Linear forward) as a single-step Pallas kernel.

    x: (B, F) activations; f32 (or bf16 only if the upstream extractor emits bf16).
    w: (C, F) weight in the PyTorch nn.Linear layout. Pass it PRE-CAST to bf16
       (done once, outside this jitted call) to halve the dominant W DMA.
    b: (1, C) bias, f32.
    tb: optional batch-tile override (must divide B, multiple of 8 unless == B).
    returns: (B, C) float32
    """
    B, F = x.shape
    C, F_w = w.shape
    assert F_w == F, "weight must be (num_classes, feature_len)"

    if tb is None:
        tb = _pick_tb(B)
    tb = min(tb, B)
    assert B % tb == 0, "batch tile must divide the batch"
    assert tb == B or tb % 8 == 0, "batch tile must be sublane-aligned (x8)"

    grid = (B // tb,)

    cost = pl.CostEstimate(
        flops=2 * B * F * C,
        transcendentals=0,
        bytes_accessed=(
            B * F * x.dtype.itemsize      # activations
            + C * F * w.dtype.itemsize    # weight (bf16 if pre-cast)
            + C * b.dtype.itemsize        # bias
            + B * C * 4                   # output
        ),
    )

    return pl.pallas_call(
        _linear_kernel,
        out_shape=jax.ShapeDtypeStruct((B, C), jnp.float32),
        grid_spec=pltpu.PrefetchScalarGridSpec(
            num_scalar_prefetch=0,
            grid=grid,
            in_specs=[
                pl.BlockSpec((tb, F), lambda i: (i, 0)),  # x batch tile, full K
                pl.BlockSpec((C, F), lambda i: (0, 0)),   # whole W, lane-dense rows, resident
                pl.BlockSpec((1, C), lambda i: (0, 0)),   # bias, resident
            ],
            out_specs=pl.BlockSpec((tb, C), lambda i: (i, 0)),
        ),
        compiler_params=pltpu.CompilerParams(
            # Batch tiles are independent -> shards across v7x megacore;
            # harmless no-op on single-TC v5e/v6e.
            dimension_semantics=("parallel",),
            vmem_limit_bytes=_vmem_limit_bytes(),
        ),
        cost_estimate=cost,
    )(x, w, b)


def init_params(key, feature_len=4096, num_classes=40, weight_dtype=jnp.float32):
    """nn.Linear-style init: U(-1/sqrt(fan_in), +1/sqrt(fan_in)).

    Weight is kept in the PyTorch layout (num_classes, feature_len): 16 KiB
    lane-dense HBM rows, which is what the kernel DMA wants.  Pass
    weight_dtype=jnp.bfloat16 to store the weight pre-cast once -- the per-call
    W DMA is then genuinely halved (accumulation stays f32 in-kernel).
    """
    kw, kb = jax.random.split(key)
    bound = 1.0 / (feature_len ** 0.5)
    w = jax.random.uniform(kw, (num_classes, feature_len), jnp.float32, -bound, bound)
    b = jax.random.uniform(kb, (1, num_classes), jnp.float32, -bound, bound)
    return w.astype(weight_dtype), b


if __name__ == "__main__":
    key = jax.random.PRNGKey(0)
    k_x, k_p = jax.random.split(key)

    batch = 8            # small batch (equals its own sublane-aligned tile)
    feature_len = 4096   # VGG13 feature length from the module __init__
    num_classes = 40

    x = jax.random.normal(k_x, (batch, feature_len), jnp.float32)
    w, b = init_params(k_p, feature_len, num_classes)   # w: (C, F), PyTorch layout

    # f32 path (bit-parity with the PyTorch f32 reference semantics).
    y = jax.block_until_ready(base_classifier_forward(x, w, b))
    y_ref = x @ w.T + b
    assert y.shape == (batch, num_classes)
    assert jnp.allclose(y, y_ref, atol=1e-4, rtol=1e-4)

    # bf16-weight path: W pre-cast ONCE outside the jitted call (as it would be
    # stored at init in deployment); x stays f32, accumulation stays f32.
    w_bf16 = w.astype(jnp.bfloat16)
    y_bf16 = jax.block_until_ready(base_classifier_forward(x, w_bf16, b))
    assert jnp.allclose(y_bf16, y_ref, atol=5e-2, rtol=5e-2)

    print("KERNEL_OK")
</pallas_src>

<mosaic_0001>
module attributes {stable_mosaic.version = 11 : i64} {
  func.func @_linear_kernel(%arg0: i32, %arg1: memref<8x4096xf32, #tpu.memory_space<vmem>>, %arg2: memref<40x4096xf32, #tpu.memory_space<vmem>>, %arg3: memref<1x40xf32, #tpu.memory_space<vmem>>, %arg4: memref<8x40xf32, #tpu.memory_space<vmem>>) attributes {dimension_semantics = [#tpu.dimension_semantics<parallel>], iteration_bounds = array<i64: 1>, scalar_prefetch = 0 : i64, scratch_operands = 0 : i64, tpu.core_type = #tpu.core_type<tc>, window_params = [{transform_indices = @transform_0, window_bounds = array<i64: 8, 4096>}, {pipeline_mode = #tpu.pipeline_mode<synchronous>, transform_indices = @transform_1, window_bounds = array<i64: 40, 4096>}, {pipeline_mode = #tpu.pipeline_mode<synchronous>, transform_indices = @transform_2, window_bounds = array<i64: 1, 40>}, {transform_indices = @transform_3, window_bounds = array<i64: 8, 40>}]} {
    %c0 = arith.constant 0 : index
    %c0_0 = arith.constant 0 : index
    %0 = vector.load %arg1[%c0, %c0_0] : memref<8x4096xf32, #tpu.memory_space<vmem>>, vector<8x4096xf32>
    %c0_1 = arith.constant 0 : index
    %c0_2 = arith.constant 0 : index
    %1 = vector.load %arg2[%c0_1, %c0_2] : memref<40x4096xf32, #tpu.memory_space<vmem>>, vector<40x4096xf32>
    %cst = arith.constant dense<0.000000e+00> : vector<8x40xf32>
    %2 = tpu.matmul %0, %1, %cst {dimension_numbers = #tpu.dot_dimension_numbers<[1], [1], [0], [0], [0, 0, 1, 0], [], []>} : vector<8x4096xf32>, vector<40x4096xf32>, vector<8x40xf32> -> vector<8x40xf32>
    %c0_3 = arith.constant 0 : index
    %c0_4 = arith.constant 0 : index
    %3 = vector.load %arg3[%c0_3, %c0_4] : memref<1x40xf32, #tpu.memory_space<vmem>>, vector<1x40xf32>
    %4 = vector.broadcast %3 : vector<1x40xf32> to vector<8x40xf32>
    %5 = arith.addf %2, %4 : vector<8x40xf32>
    %c0_5 = arith.constant 0 : index
    %c0_6 = arith.constant 0 : index
    %6 = vector.load %arg4[%c0_5, %c0_6] : memref<8x40xf32, #tpu.memory_space<vmem>>, vector<8x40xf32>
    tpu.vector_store %arg4[%c0_5, %c0_6], %5 {strides = array<i32>} : memref<8x40xf32, #tpu.memory_space<vmem>>, vector<8x40xf32>,
    return
  }
  func.func @transform_0(%arg0: i32) -> (i32, i32) {
    %c0_i32 = arith.constant 0 : i32
    %c0_i32_0 = arith.constant 0 : i32
    return %arg0, %c0_i32 : i32, i32
  }
  func.func @transform_1(%arg0: i32) -> (i32, i32) {
    %c0_i32 = arith.constant 0 : i32
    %c0_i32_0 = arith.constant 0 : i32
    %c0_i32_1 = arith.constant 0 : i32
    return %c0_i32, %c0_i32_0 : i32, i32
  }
  func.func @transform_2(%arg0: i32) -> (i32, i32) {
    %c0_i32 = arith.constant 0 : i32
    %c0_i32_0 = arith.constant 0 : i32
    %c0_i32_1 = arith.constant 0 : i32
    return %c0_i32, %c0_i32_0 : i32, i32
  }
  func.func @transform_3(%arg0: i32) -> (i32, i32) {
    %c0_i32 = arith.constant 0 : i32
    %c0_i32_0 = arith.constant 0 : i32
    return %arg0, %c0_i32 : i32, i32
  }
}

</mosaic_0001>

<bundles_post_ra>
// kernel: base_classifier_forward.1
= control target key start
LH: loop header
LB: loop body
LE: loop exit
PB: predicated region body
PF: predicated region fallthrough
CT: control target
= control target key end

     0   :  { %8 = vsyncpa [#allocation3], 0  ;;  %s1022_s0 = inlined_call_operand.hbm [shape: f32[8,4096], index: 0, kind: input, shape index: {}]   ;;  %s1023_s1 = inlined_call_operand.hbm [shape: f32[40,4096], index: 1, kind: input, shape index: {}]   ;;  %s1024_s2 = inlined_call_operand.vmem [shape: f32[1,40], index: 2, kind: input, shape index: {}]   ;;  %s1025_s3 = inlined_call_operand.hbm [shape: f32[8,40], index: 3, kind: output, shape index: {}]  }
   0x1   :  { %9 = vsyncpa [#allocation6], 0 }
   0x2   :  { %10 = vsyncpa [#allocation4], 0  ;;  %s16_s14 = sshll.u32 %s1022_s0, 4  ;;  %s985_s15 = smov [#allocation2]   ;;  %s17_s14 = int_to_ptr.hbm [resolvable:$true] %s16_s14 }
   0x3   :  { %s18_s16 = sshll.u32 %s985_s15, 4  ;;  %s26_s19 = sshll.u32 %s1023_s1, 4  ;;  %s19_s16 = int_to_ptr.vmem [resolvable:$true] %s18_s16  ;;  %s27_s19 = int_to_ptr.hbm [resolvable:$true] %s26_s19 }
   0x4   :  { %21 = dma.hbm_to_vmem [thread:$0]  %s17_s14, 4096, %s19_s16, [#allocation3]  }
   0x5   :  { %s986_s20 = smov [#allocation5]   ;;  %s987_s22 = smov 4096  }
   0x6   :  { %s28_s21 = sshll.u32 %s986_s20, 4  ;;  %s988_s23 = smov 256   ;;  %s29_s21 = int_to_ptr.vmem [resolvable:$true] %s28_s21 }
   0x7   :  { %34 = dma.hbm_to_vmem [thread:$0]  %s27_s19, 20480, %s29_s21, [#allocation6], %s987_s22, %s987_s22, %s988_s23  }
   0x8   :  { %979 = dma.done.wait [#allocation3], 4096  }
   0x9   :  { %980 = vsyncadd [#allocation3], 4294963200 }
   0xa   :  { %981 = dma.done.wait [#allocation6], 20480  }
   0xb   :  { %982 = vsyncadd [#allocation6], 4294946816  ;;  %v205_v0 = vld [vmem:[#allocation5 + $0x400] sm:$0xff]  ;;  %v207_v1 = vld [vmem:[#allocation5 + $0x410] sm:$0xff]  ;;  %s890_s27 = sshll.u32 %s1025_s3, 4  ;;  %vm881_vm0 = vcmask 326656   ;;  %s891_s27 = int_to_ptr.hbm [resolvable:$true] %s890_s27 }
   0xc   :  { %v206_v2 = vld [vmem:[#allocation5 + $0x408] sm:$0xff]  ;;  %252 = vmatpush.xpose.msra.mxu0 %v205_v0  ;;  %292 = vmatpush.xpose.msra.mxu2 %v207_v1  ;;  %v208_v3 = vld [vmem:[#allocation5 + $0x418] sm:$0xff]  ;;  %v173_v4 = vld [vmem:[#allocation5 + $0x300] sm:$0xff] }
   0xd   :  { %272 = vmatpush.xpose.msra.mxu1 %v206_v2  ;;  %312 = vmatpush.xpose.msra.mxu3 %v208_v3  ;;  %v175_v5 = vld [vmem:[#allocation5 + $0x310] sm:$0xff]  ;;  %v174_v6 = vld [vmem:[#allocation5 + $0x308] sm:$0xff]  ;;  %v176_v7 = vld [vmem:[#allocation5 + $0x318] sm:$0xff] }
   0xe   :  { %v141_v8 = vld [vmem:[#allocation5 + $0x200] sm:$0xff]  ;;  %v143_v9 = vld [vmem:[#allocation5 + $0x210] sm:$0xff]  ;;  %v142_v10 = vld [vmem:[#allocation5 + $0x208] sm:$0xff] }
   0xf   :  { %v144_v11 = vld [vmem:[#allocation5 + $0x218] sm:$0xff]  ;;  %v109_v12 = vld [vmem:[#allocation5 + $0x100] sm:$0xff]  ;;  %v111_v13 = vld [vmem:[#allocation5 + $0x110] sm:$0xff] }
  0x10   :  { %253 = vmatpush.xpose.msra.mxu0 %v173_v4  ;;  %293 = vmatpush.xpose.msra.mxu2 %v175_v5  ;;  %v110_v14 = vld [vmem:[#allocation5 + $0x108] sm:$0xff]  ;;  %v112_v15 = vld [vmem:[#allocation5 + $0x118] sm:$0xff]  ;;  %v77_v16 = vld [vmem:[#allocation5] sm:$0xff] }
  0x11   :  { %273 = vmatpush.xpose.msra.mxu1 %v174_v6  ;;  %313 = vmatpush.xpose.msra.mxu3 %v176_v7  ;;  %v79_v17 = vld [vmem:[#allocation5 + $0x10] sm:$0xff]  ;;  %v209_v18 = vld [vmem:[#allocation5 + $0x420] sm:$0xff]  ;;  %v78_v20 = vld [vmem:[#allocation5 + $0x8] sm:$0xff] }
  0x12   :  { %v211_v19 = vld [vmem:[#allocation5 + $0x430] sm:$0xff]  ;;  %v80_v21 = vld [vmem:[#allocation5 + $0x18] sm:$0xff]  ;;  %v210_v22 = vld [vmem:[#allocation5 + $0x428] sm:$0xff] }
  0x13   :  { %v212_v23 = vld [vmem:[#allocation5 + $0x438] sm:$0xff]  ;;  %v45_v24 = vld [vmem:[#allocation2] sm:$0xff]  ;;  %v47_v25 = vld [vmem:[#allocation2 + $0x10] sm:$0xff] }
  0x14   :  { %254 = vmatpush.xpose.msra.mxu0 %v141_v8  ;;  %294 = vmatpush.xpose.msra.mxu2 %v143_v9  ;;  %v177_v26 = vld [vmem:[#allocation5 + $0x320] sm:$0xff]  ;;  %v179_v27 = vld [vmem:[#allocation5 + $0x330] sm:$0xff]  ;;  %v46_v28 = vld [vmem:[#allocation2 + $0x8] sm:$0xff] }
  0x15   :  { %274 = vmatpush.xpose.msra.mxu1 %v142_v10  ;;  %314 = vmatpush.xpose.msra.mxu3 %v144_v11  ;;  %v48_v29 = vld [vmem:[#allocation2 + $0x18] sm:$0xff]  ;;  %v178_v30 = vld [vmem:[#allocation5 + $0x328] sm:$0xff]  ;;  %v145_v32 = vld [vmem:[#allocation5 + $0x220] sm:$0xff] }
  0x16   :  { %v180_v31 = vld [vmem:[#allocation5 + $0x338] sm:$0xff]  ;;  %v147_v33 = vld [vmem:[#allocation5 + $0x230] sm:$0xff]  ;;  %v146_v34 = vld [vmem:[#allocation5 + $0x228] sm:$0xff] }
  0x17   :  { %v148_v35 = vld [vmem:[#allocation5 + $0x238] sm:$0xff]  ;;  %v113_v36 = vld [vmem:[#allocation5 + $0x120] sm:$0xff]  ;;  %v115_v37 = vld [vmem:[#allocation5 + $0x130] sm:$0xff] }
  0x18   :  { %255 = vmatpush.xpose.msra.mxu0 %v109_v12  ;;  %295 = vmatpush.xpose.msra.mxu2 %v111_v13  ;;  %v114_v38 = vld [vmem:[#allocation5 + $0x128] sm:$0xff]  ;;  %v116_v39 = vld [vmem:[#allocation5 + $0x138] sm:$0xff]  ;;  %v81_v40 = vld [vmem:[#allocation5 + $0x20] sm:$0xff] }
  0x19   :  { %275 = vmatpush.xpose.msra.mxu1 %v110_v14  ;;  %315 = vmatpush.xpose.msra.mxu3 %v112_v15  ;;  %v83_v41 = vld [vmem:[#allocation5 + $0x30] sm:$0xff]  ;;  %v213_v42 = vld [vmem:[#allocation5 + $0x440] sm:$0xff]  ;;  %v82_v44 = vld [vmem:[#allocation5 + $0x28] sm:$0xff] }
  0x1a   :  { %v215_v43 = vld [vmem:[#allocation5 + $0x450] sm:$0xff]  ;;  %v84_v45 = vld [vmem:[#allocation5 + $0x38] sm:$0xff]  ;;  %v214_v46 = vld [vmem:[#allocation5 + $0x448] sm:$0xff] }
  0x1b   :  { %v216_v47 = vld [vmem:[#allocation5 + $0x458] sm:$0xff]  ;;  %v51_v48 = vld [vmem:[#allocation2 + $0x30] sm:$0xff]  ;;  %v49_v49 = vld [vmem:[#allocation2 + $0x20] sm:$0xff] }
  0x1c   :  { %256 = vmatpush.xpose.msra.mxu0 %v77_v16  ;;  %296 = vmatpush.xpose.msra.mxu2 %v79_v17  ;;  %v181_v50 = vld [vmem:[#allocation5 + $0x340] sm:$0xff]  ;;  %v183_v51 = vld [vmem:[#allocation5 + $0x350] sm:$0xff]  ;;  %v52_v52 = vld [vmem:[#allocation2 + $0x38] sm:$0xff] }
  0x1d   :  { %276 = vmatpush.xpose.msra.mxu1 %v78_v20  ;;  %316 = vmatpush.xpose.msra.mxu3 %v80_v21  ;;  %v50_v53 = vld [vmem:[#allocation2 + $0x28] sm:$0xff]  ;;  %v184_v55 = vld [vmem:[#allocation5 + $0x358] sm:$0xff]  ;;  %v149_v56 = vld [vmem:[#allocation5 + $0x240] sm:$0xff] }
  0x1e   :  { %v182_v54 = vld [vmem:[#allocation5 + $0x348] sm:$0xff]  ;;  %v151_v57 = vld [vmem:[#allocation5 + $0x250] sm:$0xff]  ;;  %v152_v59 = vld [vmem:[#allocation5 + $0x258] sm:$0xff] }
  0x1f   :  { %257 = vmatmul.f32.vlgmr.msra.gmra.mxu0 %v45_v24  ;;  %297 = vmatmul.f32.vlgmr.msra.gmra.mxu2 %v47_v25  ;;  %v150_v58 = vld [vmem:[#allocation5 + $0x248] sm:$0xff]  ;;  %v117_v60 = vld [vmem:[#allocation5 + $0x140] sm:$0xff]  ;;  %v119_v61 = vld [vmem:[#allocation5 + $0x150] sm:$0xff] }
  0x20   :  { %332 = vmatpush.xpose.msrb.mxu0 %v209_v18  ;;  %372 = vmatpush.xpose.msrb.mxu2 %v211_v19  ;;  %v118_v62 = vld [vmem:[#allocation5 + $0x148] sm:$0xff]  ;;  %v120_v63 = vld [vmem:[#allocation5 + $0x158] sm:$0xff]  ;;  %v85_v0 = vld [vmem:[#allocation5 + $0x40] sm:$0xff] }
  0x21   :  { %352 = vmatpush.xpose.msrb.mxu1 %v210_v22  ;;  %392 = vmatpush.xpose.msrb.mxu3 %v212_v23  ;;  %v87_v1 = vld [vmem:[#allocation5 + $0x50] sm:$0xff]  ;;  %v217_v2 = vld [vmem:[#allocation5 + $0x460] sm:$0xff]  ;;  %v86_v4 = vld [vmem:[#allocation5 + $0x48] sm:$0xff] }
  0x22   :  { %277 = vmatmul.f32.vlgmr.msra.gmra.mxu1 %v46_v28  ;;  %317 = vmatmul.f32.vlgmr.msra.gmra.mxu3 %v48_v29  ;;  %v219_v3 = vld [vmem:[#allocation5 + $0x470] sm:$0xff]  ;;  %v88_v5 = vld [vmem:[#allocation5 + $0x58] sm:$0xff]  ;;  %v53_v6 = vld [vmem:[#allocation2 + $0x40] sm:$0xff] }
  0x23   :  { %v55_v7 = vld [vmem:[#allocation2 + $0x50] sm:$0xff]  ;;  %v218_v8 = vld [vmem:[#allocation5 + $0x468] sm:$0xff]  ;;  %v220_v9 = vld [vmem:[#allocation5 + $0x478] sm:$0xff] }
  0x24   :  { %333 = vmatpush.xpose.msrb.mxu0 %v177_v26  ;;  %373 = vmatpush.xpose.msrb.mxu2 %v179_v27  ;;  %v54_v10 = vld [vmem:[#allocation2 + $0x48] sm:$0xff]  ;;  %v56_v11 = vld [vmem:[#allocation2 + $0x58] sm:$0xff]  ;;  %v185_v12 = vld [vmem:[#allocation5 + $0x360] sm:$0xff] }
  0x25   :  { %353 = vmatpush.xpose.msrb.mxu1 %v178_v30  ;;  %393 = vmatpush.xpose.msrb.mxu3 %v180_v31  ;;  %v187_v13 = vld [vmem:[#allocation5 + $0x370] sm:$0xff]  ;;  %v186_v14 = vld [vmem:[#allocation5 + $0x368] sm:$0xff]  ;;  %v188_v15 = vld [vmem:[#allocation5 + $0x378] sm:$0xff] }
  0x26   :  { %v153_v16 = vld [vmem:[#allocation5 + $0x260] sm:$0xff]  ;;  %v155_v17 = vld [vmem:[#allocation5 + $0x270] sm:$0xff]  ;;  %v154_v18 = vld [vmem:[#allocation5 + $0x268] sm:$0xff] }
  0x27   :  { %v156_v19 = vld [vmem:[#allocation5 + $0x278] sm:$0xff]  ;;  %v121_v20 = vld [vmem:[#allocation5 + $0x160] sm:$0xff]  ;;  %v123_v21 = vld [vmem:[#allocation5 + $0x170] sm:$0xff] }
  0x28   :  { %334 = vmatpush.xpose.msrb.mxu0 %v145_v32  ;;  %374 = vmatpush.xpose.msrb.mxu2 %v147_v33  ;;  %v122_v22 = vld [vmem:[#allocation5 + $0x168] sm:$0xff]  ;;  %v124_v23 = vld [vmem:[#allocation5 + $0x178] sm:$0xff]  ;;  %v89_v24 = vld [vmem:[#allocation5 + $0x60] sm:$0xff] }
  0x29   :  { %354 = vmatpush.xpose.msrb.mxu1 %v146_v34  ;;  %394 = vmatpush.xpose.msrb.mxu3 %v148_v35  ;;  %v91_v25 = vld [vmem:[#allocation5 + $0x70] sm:$0xff]  ;;  %v221_v26 = vld [vmem:[#allocation5 + $0x480] sm:$0xff]  ;;  %v90_v28 = vld [vmem:[#allocation5 + $0x68] sm:$0xff] }
  0x2a   :  { %v223_v27 = vld [vmem:[#allocation5 + $0x490] sm:$0xff]  ;;  %v92_v29 = vld [vmem:[#allocation5 + $0x78] sm:$0xff]  ;;  %v57_v30 = vld [vmem:[#allocation2 + $0x60] sm:$0xff] }
  0x2b   :  { %v59_v31 = vld [vmem:[#allocation2 + $0x70] sm:$0xff]  ;;  %v222_v32 = vld [vmem:[#allocation5 + $0x488] sm:$0xff]  ;;  %v224_v33 = vld [vmem:[#allocation5 + $0x498] sm:$0xff] }
  0x2c   :  { %335 = vmatpush.xpose.msrb.mxu0 %v113_v36  ;;  %375 = vmatpush.xpose.msrb.mxu2 %v115_v37  ;;  %v58_v34 = vld [vmem:[#allocation2 + $0x68] sm:$0xff]  ;;  %v60_v35 = vld [vmem:[#allocation2 + $0x78] sm:$0xff]  ;;  %v189_v36 = vld [vmem:[#allocation5 + $0x380] sm:$0xff] }
  0x2d   :  { %355 = vmatpush.xpose.msrb.mxu1 %v114_v38  ;;  %395 = vmatpush.xpose.msrb.mxu3 %v116_v39  ;;  %v191_v37 = vld [vmem:[#allocation5 + $0x390] sm:$0xff]  ;;  %v190_v38 = vld [vmem:[#allocation5 + $0x388] sm:$0xff]  ;;  %v192_v39 = vld [vmem:[#allocation5 + $0x398] sm:$0xff] }
  0x30   :  { %336 = vmatpush.xpose.msrb.mxu0 %v81_v40  ;;  %376 = vmatpush.xpose.msrb.mxu2 %v83_v41  ;;  %v157_v40 = vld [vmem:[#allocation5 + $0x280] sm:$0xff]  ;;  %v159_v41 = vld [vmem:[#allocation5 + $0x290] sm:$0xff] }
  0x31   :  { %356 = vmatpush.xpose.msrb.mxu1 %v82_v44  ;;  %396 = vmatpush.xpose.msrb.mxu3 %v84_v45  ;;  %v125_v44 = vld [vmem:[#allocation5 + $0x180] sm:$0xff]  ;;  %v127_v45 = vld [vmem:[#allocation5 + $0x190] sm:$0xff] }
  0x33   :  { %377 = vmatmul.f32.vlgmr.msrb.gmra.mxu2 %v51_v48  ;;  %337 = vmatmul.f32.vlgmr.msrb.gmra.mxu0 %v49_v49  ;;  %v93_v48 = vld [vmem:[#allocation5 + $0x80] sm:$0xff]  ;;  %v95_v49 = vld [vmem:[#allocation5 + $0x90] sm:$0xff] }
  0x34   :  { %412 = vmatpush.xpose.msra.mxu0 %v213_v42  ;;  %452 = vmatpush.xpose.msra.mxu2 %v215_v43  ;;  %v158_v42 = vld [vmem:[#allocation5 + $0x288] sm:$0xff]  ;;  %v160_v43 = vld [vmem:[#allocation5 + $0x298] sm:$0xff] }
  0x35   :  { %432 = vmatpush.xpose.msra.mxu1 %v214_v46  ;;  %472 = vmatpush.xpose.msra.mxu3 %v216_v47  ;;  %v126_v46 = vld [vmem:[#allocation5 + $0x188] sm:$0xff]  ;;  %v128_v47 = vld [vmem:[#allocation5 + $0x198] sm:$0xff] }
  0x36   :  { %397 = vmatmul.f32.vlgmr.msrb.gmra.mxu3 %v52_v52  ;;  %357 = vmatmul.f32.vlgmr.msrb.gmra.mxu1 %v50_v53  ;;  %v94_v52 = vld [vmem:[#allocation5 + $0x88] sm:$0xff]  ;;  %v96_v53 = vld [vmem:[#allocation5 + $0x98] sm:$0xff] }
  0x38   :  { %413 = vmatpush.xpose.msra.mxu0 %v181_v50  ;;  %453 = vmatpush.xpose.msra.mxu2 %v183_v51  ;;  %v225_v50 = vld [vmem:[#allocation5 + $0x4a0] sm:$0xff]  ;;  %v227_v51 = vld [vmem:[#allocation5 + $0x4b0] sm:$0xff] }
  0x39   :  { %433 = vmatpush.xpose.msra.mxu1 %v182_v54  ;;  %473 = vmatpush.xpose.msra.mxu3 %v184_v55  ;;  %v61_v54 = vld [vmem:[#allocation2 + $0x80] sm:$0xff]  ;;  %v63_v55 = vld [vmem:[#allocation2 + $0x90] sm:$0xff] }
  0x3c   :  { %414 = vmatpush.xpose.msra.mxu0 %v149_v56  ;;  %454 = vmatpush.xpose.msra.mxu2 %v151_v57  ;;  %v226_v56 = vld [vmem:[#allocation5 + $0x4a8] sm:$0xff]  ;;  %v228_v57 = vld [vmem:[#allocation5 + $0x4b8] sm:$0xff] }
  0x3d   :  { %434 = vmatpush.xpose.msra.mxu1 %v150_v58  ;;  %474 = vmatpush.xpose.msra.mxu3 %v152_v59  ;;  %v62_v58 = vld [vmem:[#allocation2 + $0x88] sm:$0xff]  ;;  %v64_v59 = vld [vmem:[#allocation2 + $0x98] sm:$0xff] }
  0x40   :  { %415 = vmatpush.xpose.msra.mxu0 %v117_v60  ;;  %455 = vmatpush.xpose.msra.mxu2 %v119_v61  ;;  %v193_v60 = vld [vmem:[#allocation5 + $0x3a0] sm:$0xff]  ;;  %v195_v61 = vld [vmem:[#allocation5 + $0x3b0] sm:$0xff] }
  0x41   :  { %435 = vmatpush.xpose.msra.mxu1 %v118_v62  ;;  %475 = vmatpush.xpose.msra.mxu3 %v120_v63  ;;  %v194_v62 = vld [vmem:[#allocation5 + $0x3a8] sm:$0xff]  ;;  %v196_v63 = vld [vmem:[#allocation5 + $0x3b8] sm:$0xff] }
  0x44   :  { %416 = vmatpush.xpose.msra.mxu0 %v85_v0  ;;  %456 = vmatpush.xpose.msra.mxu2 %v87_v1  ;;  %v161_v0 = vld [vmem:[#allocation5 + $0x2a0] sm:$0xff]  ;;  %v163_v1 = vld [vmem:[#allocation5 + $0x2b0] sm:$0xff] }
  0x45   :  { %436 = vmatpush.xpose.msra.mxu1 %v86_v4  ;;  %476 = vmatpush.xpose.msra.mxu3 %v88_v5  ;;  %v129_v4 = vld [vmem:[#allocation5 + $0x1a0] sm:$0xff]  ;;  %v131_v5 = vld [vmem:[#allocation5 + $0x1b0] sm:$0xff] }
  0x47   :  { %417 = vmatmul.f32.vlgmr.msra.gmra.mxu0 %v53_v6  ;;  %457 = vmatmul.f32.vlgmr.msra.gmra.mxu2 %v55_v7  ;;  %v130_v6 = vld [vmem:[#allocation5 + $0x1a8] sm:$0xff]  ;;  %v132_v7 = vld [vmem:[#allocation5 + $0x1b8] sm:$0xff] }
  0x48   :  { %492 = vmatpush.xpose.msrb.mxu0 %v217_v2  ;;  %532 = vmatpush.xpose.msrb.mxu2 %v219_v3  ;;  %v162_v2 = vld [vmem:[#allocation5 + $0x2a8] sm:$0xff]  ;;  %v164_v3 = vld [vmem:[#allocation5 + $0x2b8] sm:$0xff] }
  0x49   :  { %512 = vmatpush.xpose.msrb.mxu1 %v218_v8  ;;  %552 = vmatpush.xpose.msrb.mxu3 %v220_v9  ;;  %v97_v8 = vld [vmem:[#allocation5 + $0xa0] sm:$0xff]  ;;  %v99_v9 = vld [vmem:[#allocation5 + $0xb0] sm:$0xff] }
  0x4a   :  { %437 = vmatmul.f32.vlgmr.msra.gmra.mxu1 %v54_v10  ;;  %477 = vmatmul.f32.vlgmr.msra.gmra.mxu3 %v56_v11  ;;  %v229_v10 = vld [vmem:[#allocation5 + $0x4c0] sm:$0xff]  ;;  %v231_v11 = vld [vmem:[#allocation5 + $0x4d0] sm:$0xff] }
  0x4c   :  { %493 = vmatpush.xpose.msrb.mxu0 %v185_v12  ;;  %533 = vmatpush.xpose.msrb.mxu2 %v187_v13  ;;  %v98_v12 = vld [vmem:[#allocation5 + $0xa8] sm:$0xff]  ;;  %v100_v13 = vld [vmem:[#allocation5 + $0xb8] sm:$0xff] }
  0x4d   :  { %513 = vmatpush.xpose.msrb.mxu1 %v186_v14  ;;  %553 = vmatpush.xpose.msrb.mxu3 %v188_v15  ;;  %v65_v14 = vld [vmem:[#allocation2 + $0xa0] sm:$0xff]  ;;  %v67_v15 = vld [vmem:[#allocation2 + $0xb0] sm:$0xff] }
  0x50   :  { %494 = vmatpush.xpose.msrb.mxu0 %v153_v16  ;;  %534 = vmatpush.xpose.msrb.mxu2 %v155_v17  ;;  %v230_v16 = vld [vmem:[#allocation5 + $0x4c8] sm:$0xff]  ;;  %v232_v17 = vld [vmem:[#allocation5 + $0x4d8] sm:$0xff] }
  0x51   :  { %514 = vmatpush.xpose.msrb.mxu1 %v154_v18  ;;  %554 = vmatpush.xpose.msrb.mxu3 %v156_v19  ;;  %v66_v18 = vld [vmem:[#allocation2 + $0xa8] sm:$0xff]  ;;  %v68_v19 = vld [vmem:[#allocation2 + $0xb8] sm:$0xff] }
  0x54   :  { %495 = vmatpush.xpose.msrb.mxu0 %v121_v20  ;;  %535 = vmatpush.xpose.msrb.mxu2 %v123_v21  ;;  %v197_v20 = vld [vmem:[#allocation5 + $0x3c0] sm:$0xff]  ;;  %v199_v21 = vld [vmem:[#allocation5 + $0x3d0] sm:$0xff] }
  0x55   :  { %515 = vmatpush.xpose.msrb.mxu1 %v122_v22  ;;  %555 = vmatpush.xpose.msrb.mxu3 %v124_v23  ;;  %v198_v22 = vld [vmem:[#allocation5 + $0x3c8] sm:$0xff]  ;;  %v200_v23 = vld [vmem:[#allocation5 + $0x3d8] sm:$0xff] }
  0x58   :  { %496 = vmatpush.xpose.msrb.mxu0 %v89_v24  ;;  %536 = vmatpush.xpose.msrb.mxu2 %v91_v25  ;;  %v165_v24 = vld [vmem:[#allocation5 + $0x2c0] sm:$0xff]  ;;  %v167_v25 = vld [vmem:[#allocation5 + $0x2d0] sm:$0xff] }
  0x59   :  { %516 = vmatpush.xpose.msrb.mxu1 %v90_v28  ;;  %556 = vmatpush.xpose.msrb.mxu3 %v92_v29  ;;  %v133_v28 = vld [vmem:[#allocation5 + $0x1c0] sm:$0xff]  ;;  %v135_v29 = vld [vmem:[#allocation5 + $0x1d0] sm:$0xff] }
  0x5b   :  { %497 = vmatmul.f32.vlgmr.msrb.gmra.mxu0 %v57_v30  ;;  %537 = vmatmul.f32.vlgmr.msrb.gmra.mxu2 %v59_v31  ;;  %v134_v30 = vld [vmem:[#allocation5 + $0x1c8] sm:$0xff]  ;;  %v136_v31 = vld [vmem:[#allocation5 + $0x1d8] sm:$0xff] }
  0x5c   :  { %572 = vmatpush.xpose.msra.mxu0 %v221_v26  ;;  %612 = vmatpush.xpose.msra.mxu2 %v223_v27  ;;  %v166_v26 = vld [vmem:[#allocation5 + $0x2c8] sm:$0xff]  ;;  %v168_v27 = vld [vmem:[#allocation5 + $0x2d8] sm:$0xff] }
  0x5d   :  { %592 = vmatpush.xpose.msra.mxu1 %v222_v32  ;;  %632 = vmatpush.xpose.msra.mxu3 %v224_v33  ;;  %v101_v32 = vld [vmem:[#allocation5 + $0xc0] sm:$0xff]  ;;  %v103_v33 = vld [vmem:[#allocation5 + $0xd0] sm:$0xff] }
  0x5e   :  { %517 = vmatmul.f32.vlgmr.msrb.gmra.mxu1 %v58_v34  ;;  %557 = vmatmul.f32.vlgmr.msrb.gmra.mxu3 %v60_v35  ;;  %v233_v34 = vld [vmem:[#allocation5 + $0x4e0] sm:$0xff]  ;;  %v235_v35 = vld [vmem:[#allocation5 + $0x4f0] sm:$0xff] }
  0x60   :  { %573 = vmatpush.xpose.msra.mxu0 %v189_v36  ;;  %613 = vmatpush.xpose.msra.mxu2 %v191_v37  ;;  %v102_v36 = vld [vmem:[#allocation5 + $0xc8] sm:$0xff]  ;;  %v104_v37 = vld [vmem:[#allocation5 + $0xd8] sm:$0xff] }
  0x61   :  { %593 = vmatpush.xpose.msra.mxu1 %v190_v38  ;;  %633 = vmatpush.xpose.msra.mxu3 %v192_v39  ;;  %v69_v38 = vld [vmem:[#allocation2 + $0xc0] sm:$0xff]  ;;  %v71_v39 = vld [vmem:[#allocation2 + $0xd0] sm:$0xff] }
  0x64   :  { %574 = vmatpush.xpose.msra.mxu0 %v157_v40  ;;  %614 = vmatpush.xpose.msra.mxu2 %v159_v41  ;;  %v234_v40 = vld [vmem:[#allocation5 + $0x4e8] sm:$0xff]  ;;  %v236_v41 = vld [vmem:[#allocation5 + $0x4f8] sm:$0xff] }
  0x65   :  { %594 = vmatpush.xpose.msra.mxu1 %v158_v42  ;;  %634 = vmatpush.xpose.msra.mxu3 %v160_v43  ;;  %v70_v42 = vld [vmem:[#allocation2 + $0xc8] sm:$0xff]  ;;  %v72_v43 = vld [vmem:[#allocation2 + $0xd8] sm:$0xff] }
  0x68   :  { %575 = vmatpush.xpose.msra.mxu0 %v125_v44  ;;  %615 = vmatpush.xpose.msra.mxu2 %v127_v45  ;;  %v201_v44 = vld [vmem:[#allocation5 + $0x3e0] sm:$0xff]  ;;  %v203_v45 = vld [vmem:[#allocation5 + $0x3f0] sm:$0xff] }
  0x69   :  { %595 = vmatpush.xpose.msra.mxu1 %v126_v46  ;;  %635 = vmatpush.xpose.msra.mxu3 %v128_v47  ;;  %v202_v46 = vld [vmem:[#allocation5 + $0x3e8] sm:$0xff]  ;;  %v204_v47 = vld [vmem:[#allocation5 + $0x3f8] sm:$0xff] }
  0x6c   :  { %576 = vmatpush.xpose.msra.mxu0 %v93_v48  ;;  %616 = vmatpush.xpose.msra.mxu2 %v95_v49  ;;  %v169_v48 = vld [vmem:[#allocation5 + $0x2e0] sm:$0xff]  ;;  %v171_v49 = vld [vmem:[#allocation5 + $0x2f0] sm:$0xff] }
  0x6d   :  { %596 = vmatpush.xpose.msra.mxu1 %v94_v52  ;;  %636 = vmatpush.xpose.msra.mxu3 %v96_v53  ;;  %v137_v52 = vld [vmem:[#allocation5 + $0x1e0] sm:$0xff]  ;;  %v139_v53 = vld [vmem:[#allocation5 + $0x1f0] sm:$0xff] }
  0x6f   :  { %577 = vmatmul.f32.vlgmr.msra.gmra.mxu0 %v61_v54  ;;  %617 = vmatmul.f32.vlgmr.msra.gmra.mxu2 %v63_v55  ;;  %v138_v54 = vld [vmem:[#allocation5 + $0x1e8] sm:$0xff]  ;;  %v140_v55 = vld [vmem:[#allocation5 + $0x1f8] sm:$0xff] }
  0x70   :  { %652 = vmatpush.xpose.msrb.mxu0 %v225_v50  ;;  %692 = vmatpush.xpose.msrb.mxu2 %v227_v51  ;;  %v170_v50 = vld [vmem:[#allocation5 + $0x2e8] sm:$0xff]  ;;  %v172_v51 = vld [vmem:[#allocation5 + $0x2f8] sm:$0xff] }
  0x71   :  { %672 = vmatpush.xpose.msrb.mxu1 %v226_v56  ;;  %712 = vmatpush.xpose.msrb.mxu3 %v228_v57  ;;  %v105_v56 = vld [vmem:[#allocation5 + $0xe0] sm:$0xff]  ;;  %v107_v57 = vld [vmem:[#allocation5 + $0xf0] sm:$0xff] }
  0x72   :  { %597 = vmatmul.f32.vlgmr.msra.gmra.mxu1 %v62_v58  ;;  %637 = vmatmul.f32.vlgmr.msra.gmra.mxu3 %v64_v59  ;;  %v106_v58 = vld [vmem:[#allocation5 + $0xe8] sm:$0xff]  ;;  %v108_v59 = vld [vmem:[#allocation5 + $0xf8] sm:$0xff] }
  0x74   :  { %653 = vmatpush.xpose.msrb.mxu0 %v193_v60  ;;  %693 = vmatpush.xpose.msrb.mxu2 %v195_v61  ;;  %v73_v60 = vld [vmem:[#allocation2 + $0xe0] sm:$0xff]  ;;  %v75_v61 = vld [vmem:[#allocation2 + $0xf0] sm:$0xff] }
  0x75   :  { %673 = vmatpush.xpose.msrb.mxu1 %v194_v62  ;;  %713 = vmatpush.xpose.msrb.mxu3 %v196_v63  ;;  %v74_v62 = vld [vmem:[#allocation2 + $0xe8] sm:$0xff]  ;;  %v76_v63 = vld [vmem:[#allocation2 + $0xf8] sm:$0xff] }
  0x78   :  { %654 = vmatpush.xpose.msrb.mxu0 %v161_v0  ;;  %694 = vmatpush.xpose.msrb.mxu2 %v163_v1  ;;  %v906_v0 = vld [vmem:[%s1024_s2] ss:$0 sm:$0xff]  ;;  %s989_s2 = smov [#allocation7]  }
  0x79   :  { %674 = vmatpush.xpose.msrb.mxu1 %v162_v2  ;;  %714 = vmatpush.xpose.msrb.mxu3 %v164_v3  ;;  %s888_s24 = sshll.u32 %s989_s2, 4  ;;  %s889_s24 = int_to_ptr.vmem [resolvable:$true] %s888_s24 }
  0x7c   :  { %655 = vmatpush.xpose.msrb.mxu0 %v129_v4  ;;  %695 = vmatpush.xpose.msrb.mxu2 %v131_v5 }
  0x7d   :  { %675 = vmatpush.xpose.msrb.mxu1 %v130_v6  ;;  %715 = vmatpush.xpose.msrb.mxu3 %v132_v7 }
  0x80   :  { %656 = vmatpush.xpose.msrb.mxu0 %v97_v8  ;;  %696 = vmatpush.xpose.msrb.mxu2 %v99_v9 }
  0x81   :  { %676 = vmatpush.xpose.msrb.mxu1 %v98_v12  ;;  %716 = vmatpush.xpose.msrb.mxu3 %v100_v13 }
  0x83   :  { %657 = vmatmul.f32.vlgmr.msrb.gmra.mxu0 %v65_v14  ;;  %697 = vmatmul.f32.vlgmr.msrb.gmra.mxu2 %v67_v15 }
  0x84   :  { %732 = vmatpush.xpose.msra.mxu0 %v229_v10  ;;  %772 = vmatpush.xpose.msra.mxu2 %v231_v11 }
  0x85   :  { %752 = vmatpush.xpose.msra.mxu1 %v230_v16  ;;  %792 = vmatpush.xpose.msra.mxu3 %v232_v17 }
  0x86   :  { %677 = vmatmul.f32.vlgmr.msrb.gmra.mxu1 %v66_v18  ;;  %717 = vmatmul.f32.vlgmr.msrb.gmra.mxu3 %v68_v19 }
  0x88   :  { %733 = vmatpush.xpose.msra.mxu0 %v197_v20  ;;  %773 = vmatpush.xpose.msra.mxu2 %v199_v21 }
  0x89   :  { %753 = vmatpush.xpose.msra.mxu1 %v198_v22  ;;  %793 = vmatpush.xpose.msra.mxu3 %v200_v23 }
  0x8c   :  { %734 = vmatpush.xpose.msra.mxu0 %v165_v24  ;;  %774 = vmatpush.xpose.msra.mxu2 %v167_v25 }
  0x8d   :  { %754 = vmatpush.xpose.msra.mxu1 %v166_v26  ;;  %794 = vmatpush.xpose.msra.mxu3 %v168_v27 }
  0x90   :  { %735 = vmatpush.xpose.msra.mxu0 %v133_v28  ;;  %775 = vmatpush.xpose.msra.mxu2 %v135_v29 }
  0x91   :  { %755 = vmatpush.xpose.msra.mxu1 %v134_v30  ;;  %795 = vmatpush.xpose.msra.mxu3 %v136_v31 }
  0x94   :  { %736 = vmatpush.xpose.msra.mxu0 %v101_v32  ;;  %776 = vmatpush.xpose.msra.mxu2 %v103_v33 }
  0x95   :  { %756 = vmatpush.xpose.msra.mxu1 %v102_v36  ;;  %796 = vmatpush.xpose.msra.mxu3 %v104_v37 }
  0x97   :  { %737 = vmatmul.f32.vlgmr.msra.gmra.mxu0 %v69_v38  ;;  %777 = vmatmul.f32.vlgmr.msra.gmra.mxu2 %v71_v39 }
  0x98   :  { %812 = vmatpush.xpose.msrb.mxu0 %v233_v34  ;;  %852 = vmatpush.xpose.msrb.mxu2 %v235_v35 }
  0x99   :  { %832 = vmatpush.xpose.msrb.mxu1 %v234_v40  ;;  %872 = vmatpush.xpose.msrb.mxu3 %v236_v41 }
  0x9a   :  { %757 = vmatmul.f32.vlgmr.msra.gmra.mxu1 %v70_v42  ;;  %797 = vmatmul.f32.vlgmr.msra.gmra.mxu3 %v72_v43 }
  0x9c   :  { %813 = vmatpush.xpose.msrb.mxu0 %v201_v44  ;;  %853 = vmatpush.xpose.msrb.mxu2 %v203_v45  ;;  %v258_v1 = vpop.f32.mrf.mxu0 }
  0x9d   :  { %833 = vmatpush.xpose.msrb.mxu1 %v202_v46  ;;  %873 = vmatpush.xpose.msrb.mxu3 %v204_v47  ;;  %v259_v2 = vadd.f32 %v906_v0, %v258_v1 }
  0x9f   :  { %v278_v3 = vpop.f32.mrf.mxu1 }
  0xa0   :  { %814 = vmatpush.xpose.msrb.mxu0 %v169_v48  ;;  %854 = vmatpush.xpose.msrb.mxu2 %v171_v49  ;;  %v279_v4 = vadd.f32 %v278_v3, %v259_v2 }
  0xa1   :  { %834 = vmatpush.xpose.msrb.mxu1 %v170_v50  ;;  %874 = vmatpush.xpose.msrb.mxu3 %v172_v51 }
  0xa2   :  { %v298_v5 = vpop.f32.mrf.mxu2 }
  0xa3   :  { %v299_v6 = vadd.f32 %v298_v5, %v279_v4 }
  0xa4   :  { %815 = vmatpush.xpose.msrb.mxu0 %v137_v52  ;;  %855 = vmatpush.xpose.msrb.mxu2 %v139_v53 }
  0xa5   :  { %835 = vmatpush.xpose.msrb.mxu1 %v138_v54  ;;  %875 = vmatpush.xpose.msrb.mxu3 %v140_v55  ;;  %v318_v7 = vpop.f32.mrf.mxu3 }
  0xa6   :  { %v319_v8 = vadd.f32 %v318_v7, %v299_v6 }
  0xa8   :  { %816 = vmatpush.xpose.msrb.mxu0 %v105_v56  ;;  %856 = vmatpush.xpose.msrb.mxu2 %v107_v57 }
  0xa9   :  { %836 = vmatpush.xpose.msrb.mxu1 %v106_v58  ;;  %876 = vmatpush.xpose.msrb.mxu3 %v108_v59 }
  0xab   :  { %817 = vmatmul.f32.vlgmr.msrb.gmra.mxu0 %v73_v60  ;;  %857 = vmatmul.f32.vlgmr.msrb.gmra.mxu2 %v75_v61 }
  0xac   :  { %837 = vmatmul.f32.vlgmr.msrb.gmra.mxu1 %v74_v62  ;;  %877 = vmatmul.f32.vlgmr.msrb.gmra.mxu3 %v76_v63 }
  0xb0   :  { %v338_v9 = vpop.f32.mrf.mxu0 }
  0xb1   :  { %v339_v10 = vadd.f32 %v338_v9, %v319_v8 }
  0xb3   :  { %v358_v11 = vpop.f32.mrf.mxu1 }
  0xb4   :  { %v359_v12 = vadd.f32 %v358_v11, %v339_v10 }
  0xb6   :  { %v378_v13 = vpop.f32.mrf.mxu2 }
  0xb7   :  { %v379_v14 = vadd.f32 %v378_v13, %v359_v12 }
  0xb9   :  { %v398_v15 = vpop.f32.mrf.mxu3 }
  0xba   :  { %v399_v16 = vadd.f32 %v398_v15, %v379_v14 }
  0xc4   :  { %v418_v17 = vpop.f32.mrf.mxu0 }
  0xc5   :  { %v419_v18 = vadd.f32 %v418_v17, %v399_v16 }
  0xc7   :  { %v438_v19 = vpop.f32.mrf.mxu1 }
  0xc8   :  { %v439_v21 = vadd.f32 %v438_v19, %v419_v18 }
  0xca   :  { %v458_v20 = vpop.f32.mrf.mxu2 }
  0xcb   :  { %v459_v22 = vadd.f32 %v458_v20, %v439_v21 }
  0xcd   :  { %v478_v23 = vpop.f32.mrf.mxu3 }
  0xce   :  { %v479_v25 = vadd.f32 %v478_v23, %v459_v22 }
  0xd8   :  { %v498_v24 = vpop.f32.mrf.mxu0 }
  0xd9   :  { %v499_v26 = vadd.f32 %v498_v24, %v479_v25 }
  0xdb   :  { %v518_v27 = vpop.f32.mrf.mxu1 }
  0xdc   :  { %v519_v29 = vadd.f32 %v518_v27, %v499_v26 }
  0xde   :  { %v538_v28 = vpop.f32.mrf.mxu2 }
  0xdf   :  { %v539_v30 = vadd.f32 %v538_v28, %v519_v29 }
  0xe1   :  { %v558_v31 = vpop.f32.mrf.mxu3 }
  0xe2   :  { %v559_v33 = vadd.f32 %v558_v31, %v539_v30 }
  0xec   :  { %v578_v32 = vpop.f32.mrf.mxu0 }
  0xed   :  { %v579_v34 = vadd.f32 %v578_v32, %v559_v33 }
  0xef   :  { %v598_v35 = vpop.f32.mrf.mxu1 }
  0xf0   :  { %v599_v37 = vadd.f32 %v598_v35, %v579_v34 }
  0xf2   :  { %v618_v36 = vpop.f32.mrf.mxu2 }
  0xf3   :  { %v619_v38 = vadd.f32 %v618_v36, %v599_v37 }
  0xf5   :  { %v638_v39 = vpop.f32.mrf.mxu3 }
  0xf6   :  { %v639_v41 = vadd.f32 %v638_v39, %v619_v38 }
 0x100   :  { %v658_v40 = vpop.f32.mrf.mxu0 }
 0x101   :  { %v659_v42 = vadd.f32 %v658_v40, %v639_v41 }
 0x103   :  { %v678_v43 = vpop.f32.mrf.mxu1 }
 0x104   :  { %v679_v45 = vadd.f32 %v678_v43, %v659_v42 }
 0x106   :  { %v698_v44 = vpop.f32.mrf.mxu2 }
 0x107   :  { %v699_v46 = vadd.f32 %v698_v44, %v679_v45 }
 0x109   :  { %v718_v47 = vpop.f32.mrf.mxu3 }
 0x10a   :  { %v719_v49 = vadd.f32 %v718_v47, %v699_v46 }
 0x114   :  { %v738_v48 = vpop.f32.mrf.mxu0 }
 0x115   :  { %v739_v50 = vadd.f32 %v738_v48, %v719_v49 }
 0x117   :  { %v758_v51 = vpop.f32.mrf.mxu1 }
 0x118   :  { %v759_v53 = vadd.f32 %v758_v51, %v739_v50 }
 0x11a   :  { %v778_v52 = vpop.f32.mrf.mxu2 }
 0x11b   :  { %v779_v54 = vadd.f32 %v778_v52, %v759_v53 }
 0x11d   :  { %v798_v55 = vpop.f32.mrf.mxu3 }
 0x11e   :  { %v799_v56 = vadd.f32 %v798_v55, %v779_v54 }
 0x128   :  { %v818_v57 = vpop.f32.mrf.mxu0 }
 0x129   :  { %v819_v58 = vadd.f32 %v818_v57, %v799_v56  ;;  %v838_v59 = vpop.f32.mrf.mxu1 }
 0x12b   :  { %v839_v60 = vadd.f32 %v838_v59, %v819_v58 }
 0x12e   :  { %v858_v61 = vpop.f32.mrf.mxu2 }
 0x12f   :  { %v859_v62 = vadd.f32 %v858_v61, %v839_v60  ;;  %v878_v63 = vpop.f32.mrf.mxu3 }
 0x131   :  { %v879_v0 = vadd.f32 %v878_v63, %v859_v62 }
 0x133   :  { %882 = vst.msk [vmem:[#allocation7] sm:$0xff] %vm881_vm0, %v879_v0 }
 0x134   :  { %893 = dma.vmem_to_hbm [thread:$0]  %s889_s24, 128, %s891_s27, [#allocation4]  }
 0x135   :  { %983 = dma.done.wait [#allocation4], 128  }
 0x136   :  { %984 = vsyncadd [#allocation4], 4294967168 }
 0x137   :  { %898 = vsyncpa [#allocation3], 1 }
 0x138   :  { %899 = vsyncpa [#allocation6], 1 }
 0x139   :  { %900 = vsyncpa [#allocation4], 1 }

</bundles_post_ra>
